<compile_context>
chip_gen: v7x
topology: tpu7x:2x2x1
jax: 0.10.0
libtpu: 0.0.40
codegen_flags: <defaults>
</compile_context>

<pallas_src>
import functools
import math

import jax
import jax.numpy as jnp
from jax import lax
from jax.experimental import pallas as pl
from jax.experimental.pallas import tpu as pltpu


def _grad_loss_kernel(pred_ref, true_ref, out_ref, *,
                      img_h, total_rows, mask_seams, mask_ragged):
    """One grid block: whole images stacked along rows, tile shape (R, W) = (imgs*H, W).

    Writes a single f32 partial sum  sum(|sobel_x(d)| + |sobel_y(d)|)  for this block
    into its own (1,1,1) output slot (the grid axis is fully parallel).
    """
    d = pred_ref[...].astype(jnp.float32) - true_ref[...].astype(jnp.float32)
    R, W = d.shape

    zrow = jnp.zeros((1, W), jnp.float32)
    zcol = jnp.zeros((R, 1), jnp.float32)

    row = None
    if mask_seams or mask_ragged:
        # Built in-kernel (primitive), NOT a captured constant.
        row = lax.broadcasted_iota(jnp.int32, (R, W), 0)

    # ---- vertical (sublane) +/-1 zero-padded shifts of the difference image ----
    up = jnp.concatenate([zrow, d[:-1, :]], axis=0)      # d[i-1, j] (zero at block top)
    dn = jnp.concatenate([d[1:, :], zrow], axis=0)       # d[i+1, j] (zero at block bottom)
    if mask_seams:
        # Blocks stack several whole images along rows; rows at image seams must see a
        # zero neighbour, exactly like conv2d's zero padding.  jnp.where (select) is
        # NaN-safe against any garbage in out-of-range padded rows.
        rin = row % img_h
        up = jnp.where(rin == 0, 0.0, up)                # image-top rows
        dn = jnp.where(rin == img_h - 1, 0.0, dn)        # image-bottom rows

    vs = (up + d) + (d + dn)          # vertical smooth  [1,2,1]^T . d
    vd = dn - up                      # vertical diff    [-1,0,1]^T . d

    # ---- horizontal (lane) +/-1 zero-padded shifts (block width == image width) ----
    def left(x):                      # x[i, j-1], zero at j == 0
        return jnp.concatenate([zcol, x[:, :-1]], axis=1)

    def right(x):                     # x[i, j+1], zero at j == W-1
        return jnp.concatenate([x[:, 1:], zcol], axis=1)

    gx = right(vs) - left(vs)                   # == conv2d(d, sobel_x, padding=1)
    gy = (left(vd) + vd) + (vd + right(vd))     # == conv2d(d, sobel_y, padding=1)

    contrib = jnp.abs(gx) + jnp.abs(gy)
    if mask_ragged:
        # Rows of the last block that lie past the real input (whole padded images)
        # contribute exactly zero; no wrapper-side jnp.pad over HBM needed.
        grow = pl.program_id(0) * R + row
        contrib = jnp.where(grow < total_rows, contrib, 0.0)

    # In-kernel reduction (XLU; free filler while DMAs are in flight): lane reduce,
    # then sublane reduce, then a single tiny store.
    s = jnp.sum(contrib, axis=1, keepdims=True)          # (R, 1)
    s = jnp.sum(s, axis=0, keepdims=True)                # (1, 1)
    out_ref[...] = s.reshape(1, 1, 1)


# ---- block-size heuristics -----------------------------------------------------
_TARGET_BLOCK_ELEMS = 1 << 20      # ~4 MiB f32 / ~2 MiB bf16 of input per block per tensor
_VMEM_BUDGET_BYTES = 44 << 20      # safe on v5e/v6e (128 MiB phys) AND v7x (64 MiB phys)
_TEMP_F32_LIVE = 6                 # peak live full-block f32 temporaries in the stencil


def _pick_images_per_block(n, h, w, itemsize):
    per_img = max(1, h * w)
    # 2 inputs x 2 pipeline buffers at the HBM dtype + f32 stencil temporaries.
    bytes_per_elem = 4 * itemsize + _TEMP_F32_LIVE * 4
    max_elems = min(_TARGET_BLOCK_ELEMS,
                    max(per_img, (_VMEM_BUDGET_BYTES - (2 << 20)) // bytes_per_elem))
    return int(max(1, min(n, max_elems // per_img)))


def gradient_loss(pred, true, *, block_images=None):
    """pred, true: (N, 1, H, W) arrays. Returns scalar loss (f32)."""
    assert pred.shape == true.shape, "pred/true must have the same shape"
    N, C, H, W = pred.shape
    assert C == 1, "Sobel conv weight is (1,1,3,3): single input channel required"

    # (N,1,H,W) -> (N*H, W): row-major compatible reshape, no data movement.
    p2 = pred.reshape(N * H, W)
    t2 = true.reshape(N * H, W)
    total_rows = N * H
    itemsize = pred.dtype.itemsize

    bt = int(block_images) if block_images is not None else _pick_images_per_block(
        N, H, W, itemsize)
    bt = max(1, min(bt, N))
    if bt < N:
        # >1 grid block: block rows (bt*H) must be a multiple of the sublane tile
        # (8 for f32, 16 for bf16 packing, 32 for int8/fp8).
        sub = {4: 8, 2: 16, 1: 32}.get(itemsize, 8)
        align = sub // math.gcd(H, sub)
        bt = min(N, ((bt + align - 1) // align) * align)

    R = bt * H                              # block rows (whole images only)
    num_blocks = -(-N // bt)
    mask_seams = bt > 1                     # image seams inside a block need zero rows
    mask_ragged = num_blocks * bt > N       # last block contains out-of-range images

    kernel = functools.partial(
        _grad_loss_kernel, img_h=H, total_rows=total_rows,
        mask_seams=mask_seams, mask_ragged=mask_ragged)

    block_bytes_in = R * W * itemsize
    block_bytes_f32 = R * W * 4
    vmem_need = 4 * block_bytes_in + _TEMP_F32_LIVE * block_bytes_f32 + (2 << 20)
    vmem_limit = int(min(48 << 20, max(32 << 20, vmem_need)))

    partials = pl.pallas_call(
        kernel,
        out_shape=jax.ShapeDtypeStruct((num_blocks, 1, 1), jnp.float32),
        grid_spec=pltpu.PrefetchScalarGridSpec(
            num_scalar_prefetch=0,
            grid=(num_blocks,),
            in_specs=[pl.BlockSpec((R, W), lambda i: (i, 0)),
                      pl.BlockSpec((R, W), lambda i: (i, 0))],
            # Each block writes its own partial-sum slot -> no resident accumulator.
            out_specs=pl.BlockSpec((1, 1, 1), lambda i: (i, 0, 0)),
        ),
        compiler_params=pltpu.CompilerParams(
            dimension_semantics=("parallel",),       # independent blocks (v7x: 2 TCs)
            vmem_limit_bytes=vmem_limit),
    )(p2, t2)

    # Tiny deferred reduction over per-block partials + normalization.
    return jnp.sum(partials) / jnp.float32(N * C * H * W)


def _reference_loss(pred, true):
    """Pure-JAX reference of the PyTorch forward (sanity check)."""
    sx = jnp.asarray([[-1.0, 0.0, 1.0], [-2.0, 0.0, 2.0], [-1.0, 0.0, 1.0]],
                     jnp.float32).reshape(1, 1, 3, 3)
    sy = jnp.asarray([[-1.0, -2.0, -1.0], [0.0, 0.0, 0.0], [1.0, 2.0, 1.0]],
                     jnp.float32).reshape(1, 1, 3, 3)

    def conv(x, w):
        return lax.conv_general_dilated(
            x.astype(jnp.float32), w, window_strides=(1, 1),
            padding=((1, 1), (1, 1)),
            dimension_numbers=("NCHW", "OIHW", "NCHW"))

    gdx = jnp.abs(conv(pred, sx) - conv(true, sx))
    gdy = jnp.abs(conv(pred, sy) - conv(true, sy))
    return jnp.mean(gdx) + jnp.mean(gdy)


if __name__ == "__main__":
    key = jax.random.PRNGKey(0)
    k1, k2, k3, k4 = jax.random.split(key, 4)

    # Small deterministic example consistent with the module's (N,1,H,W) inputs.
    N, C, H, W = 2, 1, 16, 16
    pred = jax.random.normal(k1, (N, C, H, W), dtype=jnp.float32)
    true = jax.random.normal(k2, (N, C, H, W), dtype=jnp.float32)

    loss = jax.block_until_ready(gradient_loss(pred, true))
    ref = jax.block_until_ready(_reference_loss(pred, true))
    assert jnp.allclose(loss, ref, rtol=1e-5, atol=1e-5), (loss, ref)

    # Ragged-N multi-block path: image-seam masks + in-kernel tail masking (no jnp.pad)
    # + per-block parallel partial sums.
    N2 = 3
    pred2 = jax.random.normal(k3, (N2, 1, H, W), dtype=jnp.float32)
    true2 = jax.random.normal(k4, (N2, 1, H, W), dtype=jnp.float32)
    loss2 = jax.block_until_ready(gradient_loss(pred2, true2, block_images=2))
    ref2 = jax.block_until_ready(_reference_loss(pred2, true2))
    assert jnp.allclose(loss2, ref2, rtol=1e-5, atol=1e-5), (loss2, ref2)

    print("KERNEL_OK")
</pallas_src>

<mosaic_0001>
module attributes {stable_mosaic.version = 11 : i64} {
  func.func @_grad_loss_kernel(%arg0: i32, %arg1: memref<32x16xf32, #tpu.memory_space<vmem>>, %arg2: memref<32x16xf32, #tpu.memory_space<vmem>>, %arg3: memref<1x1x1xf32, #tpu.memory_space<vmem>>) attributes {dimension_semantics = [#tpu.dimension_semantics<parallel>], iteration_bounds = array<i64: 1>, scalar_prefetch = 0 : i64, scratch_operands = 0 : i64, tpu.core_type = #tpu.core_type<tc>, window_params = [{transform_indices = @transform_0, window_bounds = array<i64: 32, 16>}, {transform_indices = @transform_1, window_bounds = array<i64: 32, 16>}, {transform_indices = @transform_2, window_bounds = array<i64: 1, 1, 1>}]} {
    %c0 = arith.constant 0 : index
    %c0_0 = arith.constant 0 : index
    %0 = vector.load %arg1[%c0, %c0_0] : memref<32x16xf32, #tpu.memory_space<vmem>>, vector<32x16xf32>
    %c0_1 = arith.constant 0 : index
    %c0_2 = arith.constant 0 : index
    %1 = vector.load %arg2[%c0_1, %c0_2] : memref<32x16xf32, #tpu.memory_space<vmem>>, vector<32x16xf32>
    %2 = arith.subf %0, %1 : vector<32x16xf32>
    %cst = arith.constant 0.000000e+00 : f32
    %3 = vector.broadcast %cst : f32 to vector<1x16xf32>
    %cst_3 = arith.constant 0.000000e+00 : f32
    %4 = vector.broadcast %cst_3 : f32 to vector<32x1xf32>
    %5 = tpu.iota {dimensions = array<i32: 0>} : vector<32x16xi32>
    %6 = vector.extract_strided_slice %2 {offsets = [0, 0], sizes = [31, 16], strides = [1, 1]} : vector<32x16xf32> to vector<31x16xf32>
    %7 = tpu.concatenate %3, %6 in 0 : vector<1x16xf32>, vector<31x16xf32> -> vector<32x16xf32>
    %8 = vector.extract_strided_slice %2 {offsets = [1, 0], sizes = [31, 16], strides = [1, 1]} : vector<32x16xf32> to vector<31x16xf32>
    %9 = tpu.concatenate %8, %3 in 0 : vector<31x16xf32>, vector<1x16xf32> -> vector<32x16xf32>
    %c16_i32 = arith.constant 16 : i32
    %c0_i32 = arith.constant 0 : i32
    %10 = arith.cmpi eq, %c16_i32, %c0_i32 : i32
    %c1_i32 = arith.constant 1 : i32
    %11 = arith.select %10, %c1_i32, %c16_i32 : i32
    %12 = vector.broadcast %11 : i32 to vector<32x16xi32>
    %13 = arith.remsi %5, %12 : vector<32x16xi32>
    %c0_i32_4 = arith.constant 0 : i32
    %14 = vector.broadcast %c0_i32_4 : i32 to vector<32x16xi32>
    %15 = arith.cmpi ne, %13, %14 : vector<32x16xi32>
    %c0_i32_5 = arith.constant 0 : i32
    %16 = vector.broadcast %c0_i32_5 : i32 to vector<32x16xi32>
    %17 = arith.cmpi slt, %13, %16 : vector<32x16xi32>
    %c0_i32_6 = arith.constant 0 : i32
    %18 = arith.cmpi slt, %11, %c0_i32_6 : i32
    %19 = vector.broadcast %18 : i1 to vector<32x16xi1>
    %20 = vector.broadcast %19 : vector<32x16xi1> to vector<32x16xi1>
    %21 = arith.xori %17, %20 : vector<32x16xi1>
    %22 = arith.andi %21, %15 : vector<32x16xi1>
    %23 = vector.broadcast %11 : i32 to vector<32x16xi32>
    %24 = arith.addi %13, %23 : vector<32x16xi32>
    %25 = arith.select %22, %24, %13 : vector<32x16xi1>, vector<32x16xi32>
    %c0_i32_7 = arith.constant 0 : i32
    %26 = vector.broadcast %c0_i32_7 : i32 to vector<32x16xi32>
    %27 = arith.cmpi eq, %25, %26 : vector<32x16xi32>
    %cst_8 = arith.constant 0.000000e+00 : f32
    %28 = vector.broadcast %cst_8 : f32 to vector<32x16xf32>
    %29 = arith.select %27, %28, %7 : vector<32x16xi1>, vector<32x16xf32>
    %c15_i32 = arith.constant 15 : i32
    %30 = vector.broadcast %c15_i32 : i32 to vector<32x16xi32>
    %31 = arith.cmpi eq, %25, %30 : vector<32x16xi32>
    %cst_9 = arith.constant 0.000000e+00 : f32
    %32 = vector.broadcast %cst_9 : f32 to vector<32x16xf32>
    %33 = arith.select %31, %32, %9 : vector<32x16xi1>, vector<32x16xf32>
    %34 = arith.addf %29, %2 : vector<32x16xf32>
    %35 = arith.addf %2, %33 : vector<32x16xf32>
    %36 = arith.addf %34, %35 : vector<32x16xf32>
    %37 = arith.subf %33, %29 : vector<32x16xf32>
    %38 = vector.extract_strided_slice %36 {offsets = [0, 1], sizes = [32, 15], strides = [1, 1]} : vector<32x16xf32> to vector<32x15xf32>
    %39 = tpu.concatenate %38, %4 in 1 : vector<32x15xf32>, vector<32x1xf32> -> vector<32x16xf32>
    %40 = vector.extract_strided_slice %36 {offsets = [0, 0], sizes = [32, 15], strides = [1, 1]} : vector<32x16xf32> to vector<32x15xf32>
    %41 = tpu.concatenate %4, %40 in 1 : vector<32x1xf32>, vector<32x15xf32> -> vector<32x16xf32>
    %42 = arith.subf %39, %41 : vector<32x16xf32>
    %43 = vector.extract_strided_slice %37 {offsets = [0, 0], sizes = [32, 15], strides = [1, 1]} : vector<32x16xf32> to vector<32x15xf32>
    %44 = tpu.concatenate %4, %43 in 1 : vector<32x1xf32>, vector<32x15xf32> -> vector<32x16xf32>
    %45 = arith.addf %44, %37 : vector<32x16xf32>
    %46 = vector.extract_strided_slice %37 {offsets = [0, 1], sizes = [32, 15], strides = [1, 1]} : vector<32x16xf32> to vector<32x15xf32>
    %47 = tpu.concatenate %46, %4 in 1 : vector<32x15xf32>, vector<32x1xf32> -> vector<32x16xf32>
    %48 = arith.addf %37, %47 : vector<32x16xf32>
    %49 = arith.addf %45, %48 : vector<32x16xf32>
    %50 = math.absf %42 : vector<32x16xf32>
    %51 = math.absf %49 : vector<32x16xf32>
    %52 = arith.addf %50, %51 : vector<32x16xf32>
    %cst_10 = arith.constant dense<0.000000e+00> : vector<32xf32>
    %53 = vector.multi_reduction <add>, %52, %cst_10 [1] : vector<32x16xf32> to vector<32xf32>
    %54 = vector.shape_cast %53 : vector<32xf32> to vector<32x1xf32>
    %cst_11 = arith.constant dense<0.000000e+00> : vector<1xf32>
    %55 = vector.multi_reduction <add>, %54, %cst_11 [0] : vector<32x1xf32> to vector<1xf32>
    %56 = vector.shape_cast %55 : vector<1xf32> to vector<1x1xf32>
    %57 = vector.shape_cast %56 : vector<1x1xf32> to vector<1x1x1xf32>
    %c0_12 = arith.constant 0 : index
    %c0_13 = arith.constant 0 : index
    %c0_14 = arith.constant 0 : index
    %58 = vector.load %arg3[%c0_12, %c0_13, %c0_14] : memref<1x1x1xf32, #tpu.memory_space<vmem>>, vector<1x1x1xf32>
    tpu.vector_store %arg3[%c0_12, %c0_13, %c0_14], %57 {strides = array<i32>} : memref<1x1x1xf32, #tpu.memory_space<vmem>>, vector<1x1x1xf32>,
    return
  }
  func.func @transform_0(%arg0: i32) -> (i32, i32) {
    %c0_i32 = arith.constant 0 : i32
    %c0_i32_0 = arith.constant 0 : i32
    return %arg0, %c0_i32 : i32, i32
  }
  func.func @transform_1(%arg0: i32) -> (i32, i32) {
    %c0_i32 = arith.constant 0 : i32
    %c0_i32_0 = arith.constant 0 : i32
    return %arg0, %c0_i32 : i32, i32
  }
  func.func @transform_2(%arg0: i32) -> (i32, i32, i32) {
    %c0_i32 = arith.constant 0 : i32
    %c0_i32_0 = arith.constant 0 : i32
    %c0_i32_1 = arith.constant 0 : i32
    return %arg0, %c0_i32, %c0_i32_0 : i32, i32, i32
  }
}

</mosaic_0001>

<bundles_post_ra>
// kernel: tpu_custom_call.1
= control target key start
LH: loop header
LB: loop body
LE: loop exit
PB: predicated region body
PF: predicated region fallthrough
CT: control target
= control target key end

     0   :  { %v24_v3 = vlaneseq  ;;  %vm33_vm0 = vcmask 1040384   ;;  %s416_s0 = inlined_call_operand.vmem [shape: f32[32,16], index: 0, kind: input, shape index: {}]   ;;  %s417_s1 = inlined_call_operand.vmem [shape: f32[32,16], index: 1, kind: input, shape index: {}]   ;;  %s418_s2 = inlined_call_operand.hbm [shape: f32[1,1,1], index: 2, kind: output, shape index: {}]  }
   0x1   :  { %v12_v0 = vld [vmem:[%s416_s0] sm:$0xff]  ;;  %v13_v1 = vld [vmem:[%s416_s0 + $0x8] sm:$0xff]  ;;  %v14_v6 = vld [vmem:[%s416_s0 + $0x10] sm:$0xff] }
   0x2   :  { %v16_v2 = vld [vmem:[%s417_s1] sm:$0xff]  ;;  %v17_v4 = vld [vmem:[%s417_s1 + $0x8] sm:$0xff]  ;;  %v18_v7 = vld [vmem:[%s417_s1 + $0x10] sm:$0xff]  ;;  %v25_v9 = vshrl.u32 %v24_v3, 7 }
   0x3   :  { %v20_v5 = vsub.f32 %v12_v0, %v16_v2  ;;  %v21_v8 = vsub.f32 %v13_v1, %v17_v4  ;;  %v22_v10 = vsub.f32 %v14_v6, %v18_v7 }
   0x4   :  { %7 = vsyncpa [#allocation3], 0  ;;  %vm46_vm1 = vcmask 1046528   ;;  %v63_v14 = vand.u32 15, %v25_v9  ;;  %v26_v15 = vadd.s32 8, %v25_v9  ;;  %v15_v25 = vld [vmem:[%s416_s0 + $0x18] sm:$0xff] }
   0x5   :  { %v34_v11 = vrot.slane %v20_v5, 7  ;;  %v47_v12 = vrot.slane %v20_v5, 1  ;;  %v48_v13 = vrot.slane %v21_v8, 1  ;;  %v35_v16 = vrot.slane %v21_v8, 7  ;;  %v19_v26 = vld [vmem:[%s417_s1 + $0x18] sm:$0xff]  ;;  %s306_s25 = smov 127  }
   0x6   :  { %v50_v18 = vrot.slane %v22_v10, 1  ;;  %vm107_vm2 = vcmp.eq.s32.totalorder %v63_v14, 0  ;;  %v70_v20 = vand.u32 15, %v26_v15  ;;  %v27_v27 = vadd.s32 16, %v25_v9  ;;  %s307_s26 = smov 1   ;;  %s308_s0 = smov [#allocation2]  }
   0x7   :  { %v45_v17 = vsel %vm33_vm0, 0.0, %v34_v11  ;;  %v49_v19 = vsel %vm46_vm1, %v47_v12, %v48_v13  ;;  %v36_v22 = vsel %vm33_vm0, %v34_v11, %v35_v16  ;;  %v23_v34 = vsub.f32 %v15_v25, %v19_v26  ;;  %s271_s1 = sshll.u32 %s308_s0, 4  ;;  %s272_s1 = int_to_ptr.vmem [resolvable:$true] %s271_s1 }
   0x8   :  { %v111_v21 = vsel %vm107_vm2, 0.0, %v45_v17  ;;  %v51_v23 = vsel %vm46_vm1, %v48_v13, %v50_v18  ;;  %vm116_vm3 = vcmp.eq.s32.totalorder %v70_v20, 15  ;;  %v127_v29 = vadd.f32 %v49_v19, %v20_v5  ;;  %s282_s27 = scalar_lea.vmem %s272_s1, 16  ;;  %s286_s28 = scalar_lea.vmem %s272_s1, 32 }
   0x9   :  { %v346_v24 = vsub.f32 %v49_v19, %v111_v21  ;;  %v120_v28 = vsel %vm116_vm3, 0.0, %v51_v23  ;;  %v124_v30 = vadd.f32 %v36_v22, %v21_v8  ;;  %v123_v32 = vadd.f32 %v111_v21, %v20_v5  ;;  %p283_p0 = scmp.ne.s32.totalorder %s272_s1, %s282_s27  ;;  %p287_p1 = scmp.lt.s32.totalorder %s272_s1, %s272_s1 }
   0xa   :  { %v136_v31 = vsub.f32 %v120_v28, %v36_v22  ;;  %v128_v33 = vadd.f32 %v120_v28, %v21_v8  ;;  %v37_v35 = vrot.slane %v22_v10, 7  ;;  %v77_v36 = vand.u32 15, %v27_v27  ;;  %p288_p2 = scmp.lt.s32.totalorder %s286_s28, %s282_s27 }
   0xb   :  { %205 = vrot.lane.b32.xlu1 %v346_v24, %s306_s25  ;;  %185 = vrot.lane.b32.xlu0 %v346_v24, %s307_s26  ;;  %v131_v37 = vadd.f32 %v127_v29, %v123_v32  ;;  %v52_v39 = vrot.slane %v23_v34, 1  ;;  %v28_v41 = vadd.s32 24, %v25_v9  ;;  %v39_v48 = vrot.slane %v23_v34, 7 }
   0xc   :  { %v132_v38 = vadd.f32 %v128_v33, %v124_v30  ;;  %v38_v40 = vsel %vm33_vm0, %v35_v16, %v37_v35  ;;  %vm109_vm4 = vcmp.eq.s32.totalorder %v77_v36, 0  ;;  %vm155_vm6 = vcmask 121856   ;;  %p289_p3 = por %p288_p2, %p287_p1 }
   0xd   :  { %v53_v42 = vsel %vm46_vm1, %v50_v18, %v52_v39  ;;  %v113_v43 = vsel %vm109_vm4, 0.0, %v38_v40  ;;  %v84_v44 = vand.u32 15, %v28_v41  ;;  %v58_v49 = vsel %vm46_vm1, %v52_v39, 0.0 }
   0xe   :  { %v137_v45 = vsub.f32 %v53_v42, %v113_v43  ;;  %v125_v46 = vadd.f32 %v113_v43, %v22_v10  ;;  %v129_v47 = vadd.f32 %v53_v42, %v22_v10  ;;  %v40_v51 = vsel %vm33_vm0, %v37_v35, %v39_v48  ;;  %p290_p4 = pnand %p289_p3, %p283_p0 }
   0xf   :  { %207 = vrot.lane.b32.xlu1 %v136_v31, %s306_s25  ;;  %187 = vrot.lane.b32.xlu0 %v136_v31, %s307_s26  ;;  %vm118_vm5 = vcmp.eq.s32.totalorder %v84_v44, 15  ;;  %v126_v54 = vadd.f32 %v40_v51, %v23_v34  ;;  %vm172_vm7 = vcmask 7168   ;;  %vm241_vm8 = vcmask 130048  }
  0x10   :  { %v133_v50 = vadd.f32 %v129_v47, %v125_v46  ;;  %v122_v52 = vsel %vm118_vm5, 0.0, %v58_v49  ;;  %vm263_vm9 = vcmask 0  }
  0x11   :  { %v372_v53 = vsub.f32 %v122_v52, %v40_v51  ;;  %v130_v55 = vadd.f32 %v122_v52, %v23_v34 }
  0x13   :  { %143 = vrot.lane.b32.xlu0 %v131_v37, %s306_s25  ;;  %145 = vrot.lane.b32.xlu1 %v132_v38, %s306_s25  ;;  %v134_v56 = vadd.f32 %v130_v55, %v126_v54 }
  0x17   :  { %160 = vrot.lane.b32.xlu0 %v131_v37, %s307_s26  ;;  %162 = vrot.lane.b32.xlu1 %v132_v38, %s307_s26 }
  0x1b   :  { %189 = vrot.lane.b32.xlu0 %v137_v45, %s307_s26  ;;  %209 = vrot.lane.b32.xlu1 %v137_v45, %s306_s25 }
  0x1f   :  { %147 = vrot.lane.b32.xlu0 %v133_v50, %s306_s25  ;;  %164 = vrot.lane.b32.xlu1 %v133_v50, %s307_s26 }
  0x23   :  { %191 = vrot.lane.b32.xlu0 %v372_v53, %s307_s26  ;;  %211 = vrot.lane.b32.xlu1 %v372_v53, %s306_s25 }
  0x27   :  { %149 = vrot.lane.b32.xlu0 %v134_v56, %s306_s25  ;;  %166 = vrot.lane.b32.xlu1 %v134_v56, %s307_s26 }
  0x7d   :  { %v206_v57 = vpop.permute.xlu1 %205  ;;  %v186_v58 = vpop.permute.xlu0 %185 }
  0x7e   :  { %v217_v59 = vsel %vm155_vm6, %v206_v57, 0.0  ;;  %v197_v60 = vsel %vm172_vm7, 0.0, %v186_v58 }
  0x7f   :  { %v221_v1 = vadd.f32 %v217_v59, %v346_v24  ;;  %v201_v2 = vadd.f32 %v197_v60, %v346_v24 }
  0x81   :  { %v208_v61 = vpop.permute.xlu1 %207  ;;  %v188_v62 = vpop.permute.xlu0 %187  ;;  %v225_v7 = vadd.f32 %v221_v1, %v201_v2 }
  0x82   :  { %v218_v63 = vsel %vm155_vm6, %v208_v61, 0.0  ;;  %v198_v0 = vsel %vm172_vm7, 0.0, %v188_v62 }
  0x83   :  { %v222_v3 = vadd.f32 %v218_v63, %v136_v31  ;;  %v202_v4 = vadd.f32 %v198_v0, %v136_v31  ;;  %v233_v17 = vand.u32 2147483647, %v225_v7 }
  0x85   :  { %v144_v5 = vpop.permute.xlu0 %143  ;;  %v146_v6 = vpop.permute.xlu1 %145  ;;  %v226_v8 = vadd.f32 %v222_v3, %v202_v4 }
  0x86   :  { %v156_v11 = vsel %vm155_vm6, %v144_v5, 0.0  ;;  %v157_v12 = vsel %vm155_vm6, %v146_v6, 0.0 }
  0x87   :  { %v234_v18 = vand.u32 2147483647, %v226_v8 }
  0x89   :  { %v161_v9 = vpop.permute.xlu0 %160  ;;  %v163_v10 = vpop.permute.xlu1 %162 }
  0x8a   :  { %v173_v13 = vsel %vm172_vm7, 0.0, %v161_v9  ;;  %v174_v14 = vsel %vm172_vm7, 0.0, %v163_v10 }
  0x8b   :  { %v177_v15 = vsub.f32 %v156_v11, %v173_v13  ;;  %v178_v16 = vsub.f32 %v157_v12, %v174_v14 }
  0x8d   :  { %v229_v19 = vand.u32 2147483647, %v177_v15  ;;  %v230_v20 = vand.u32 2147483647, %v178_v16  ;;  %v190_v21 = vpop.permute.xlu0 %189  ;;  %v210_v22 = vpop.permute.xlu1 %209 }
  0x8e   :  { %v199_v23 = vsel %vm172_vm7, 0.0, %v190_v21  ;;  %v219_v24 = vsel %vm155_vm6, %v210_v22, 0.0 }
  0x8f   :  { %v203_v25 = vadd.f32 %v199_v23, %v137_v45  ;;  %v223_v26 = vadd.f32 %v219_v24, %v137_v45  ;;  %v237_v27 = vadd.f32 %v233_v17, %v229_v19  ;;  %v238_v28 = vadd.f32 %v234_v18, %v230_v20 }
  0x91   :  { %v227_v29 = vadd.f32 %v223_v26, %v203_v25  ;;  %v148_v30 = vpop.permute.xlu0 %147  ;;  %v165_v31 = vpop.permute.xlu1 %164  ;;  %v242_v32 = vsel %vm241_vm8, %v237_v27, 0.0  ;;  %v245_v33 = vsel %vm241_vm8, %v238_v28, 0.0 }
  0x92   :  { %v158_v34 = vsel %vm155_vm6, %v148_v30, 0.0  ;;  %v175_v35 = vsel %vm172_vm7, 0.0, %v165_v31  ;;  %243 = vadd.xlane.f32.xlu0 %v242_v32  ;;  %246 = vadd.xlane.f32.xlu1 %v245_v33 }
  0x93   :  { %v179_v36 = vsub.f32 %v158_v34, %v175_v35  ;;  %v235_v37 = vand.u32 2147483647, %v227_v29 }
  0x95   :  { %v231_v38 = vand.u32 2147483647, %v179_v36  ;;  %v192_v39 = vpop.permute.xlu0 %191  ;;  %v212_v40 = vpop.permute.xlu1 %211 }
  0x96   :  { %v200_v41 = vsel %vm172_vm7, 0.0, %v192_v39  ;;  %v220_v42 = vsel %vm155_vm6, %v212_v40, 0.0 }
  0x97   :  { %v204_v43 = vadd.f32 %v200_v41, %v372_v53  ;;  %v224_v44 = vadd.f32 %v220_v42, %v372_v53  ;;  %v239_v45 = vadd.f32 %v235_v37, %v231_v38 }
  0x99   :  { %v228_v46 = vadd.f32 %v224_v44, %v204_v43  ;;  %v150_v47 = vpop.permute.xlu0 %149  ;;  %v167_v48 = vpop.permute.xlu1 %166  ;;  %v248_v49 = vsel %vm241_vm8, %v239_v45, 0.0 }
  0x9a   :  { %v159_v50 = vsel %vm155_vm6, %v150_v47, 0.0  ;;  %v176_v51 = vsel %vm172_vm7, 0.0, %v167_v48  ;;  %249 = vadd.xlane.f32.xlu0 %v248_v49 }
  0x9b   :  { %v180_v52 = vsub.f32 %v159_v50, %v176_v51  ;;  %v236_v54 = vand.u32 2147483647, %v228_v46 }
  0x9d   :  { %v232_v55 = vand.u32 2147483647, %v180_v52 }
  0x9f   :  { %v240_v56 = vadd.f32 %v236_v54, %v232_v55 }
  0xa1   :  { %v251_v57 = vsel %vm241_vm8, %v240_v56, 0.0 }
  0xa2   :  { %252 = vadd.xlane.f32.xlu0 %v251_v57 }
 0x11f   :  { %v244_v58 = vpop.xlane.xlu0 %243  ;;  %v247_v53 = vpop.xlane.xlu1 %246 }
 0x120   :  { %v254_v60 = vadd.f32 %v247_v53, %v244_v58 }
 0x127   :  { %v250_v59 = vpop.xlane.xlu0 %249 }
 0x128   :  { %v255_v61 = vadd.f32 %v254_v60, %v250_v59 }
 0x12f   :  { %v253_v62 = vpop.xlane.xlu0 %252 }
 0x130   :  { %v256_v63 = vadd.f32 %v255_v61, %v253_v62 }
 0x132   :  { %v257_v0 = vrot.slane %v256_v63, 4 }
 0x134   :  { %v258_v1 = vadd.f32 %v257_v0, %v256_v63 }
 0x136   :  { %v259_v2 = vrot.slane %v258_v1, 2 }
 0x138   :  { %v260_v3 = vadd.f32 %v259_v2, %v258_v1 }
 0x13a   :  { %v261_v4 = vrot.slane %v260_v3, 1 }
 0x13c   :  { %v262_v5 = vadd.f32 %v261_v4, %v260_v3 }
 0x13e   :  { %264 = vst.msk [vmem:[#allocation2] sm:$0x1] %vm263_vm9, %v262_v5 }
 0x13f   :  { %293 = shalt.err (!%p290_p4)
}
 0x140   :  { %s294_s3 = scalar_lea.hbm %s418_s2, 16 }
 0x141   :  { %p295_p5 = scmp.ne.s32.totalorder %s418_s2, %s294_s3  ;;  %p298_p6 = scmp.lt.u32.totalorder %s294_s3, %s418_s2 }
 0x143   :  { %p300_p7 = pnand %p298_p6, %p295_p5 }
 0x145   :  { %303 = shalt.err (!%p300_p7)
}
 0x146   :  { %274 = dma.vmem_to_hbm [thread:$0]  %s272_s1, 16, %s418_s2, [#allocation3]  }
 0x147   :  { %304 = dma.done.wait [#allocation3], 16  }
 0x148   :  { %305 = vsyncadd [#allocation3], 4294967280 }
 0x149   :  { %278 = vsyncpa [#allocation3], 1 }

</bundles_post_ra>
